<compile_context>
chip_gen: v5e
topology: v5e:2x2
jax: 0.10.0
libtpu: 0.0.40
codegen_flags: <defaults>
</compile_context>

<pallas_src>
import math
import functools

import jax
import jax.numpy as jnp
from jax.experimental import pallas as pl
from jax.experimental.pallas import tpu as pltpu

EPS = 1e-5  # torch.nn.LayerNorm default eps

FUSED_PARAM_NAMES = ["wqkv", "bqkv", "wo", "bo", "g1", "be1",
                     "w1", "b1", "w2", "b2", "g2", "be2"]


def encoder_block_kernel(x_ref, wqkv_ref, bqkv_ref, wo_ref, bo_ref,
                         g1_ref, be1_ref, w1_ref, b1_ref, w2_ref, b2_ref,
                         g2_ref, be2_ref, out_ref, *, num_heads, seq_len, batch_block):
    # One grid step == `batch_block` batch elements, flattened to (Bt*S, E) rows.
    E = x_ref.shape[-1]
    H = num_heads
    hd = E // H
    S = seq_len
    bt = batch_block
    scale = 1.0 / math.sqrt(hd)

    x = x_ref[...]                                  # (Bt*S, E) f32 (residual path)
    x16 = x.astype(jnp.bfloat16)

    # --- fused QKV projection (bf16 operands, f32 accumulation) --------------
    qkv = jnp.dot(x16, wqkv_ref[...], preferred_element_type=jnp.float32) + bqkv_ref[...]
    q = qkv[:, 0:E] * scale                         # fold 1/sqrt(hd) into q
    k = qkv[:, E:2 * E]
    v = qkv[:, 2 * E:3 * E]

    def to_heads(a):                                # (S, E) f32 -> (H, S, hd) bf16
        return jnp.stack([a[:, h * hd:(h + 1) * hd] for h in range(H)],
                         axis=0).astype(jnp.bfloat16)

    # --- head-batched self attention, per batch element ----------------------
    ctx_rows = []
    for b in range(bt):                             # static, small unroll
        rows = slice(b * S, (b + 1) * S)
        qh = to_heads(q[rows])
        kh = to_heads(k[rows])
        vh = to_heads(v[rows])
        energy = jnp.einsum("hqd,hkd->hqk", qh, kh,
                            preferred_element_type=jnp.float32)      # (H, S, S) f32
        # TODO(synk): optional attention mask (mask_input) not plumbed through.
        energy = energy - jnp.max(energy, axis=-1, keepdims=True)
        p = jnp.exp(energy)
        p = p * pl.reciprocal(jnp.sum(p, axis=-1, keepdims=True), approx=True)
        ctxh = jnp.einsum("hqk,hkd->hqd", p.astype(jnp.bfloat16), vh,
                          preferred_element_type=jnp.float32)        # (H, S, hd) f32
        ctx_rows.append(jnp.concatenate([ctxh[h] for h in range(H)], axis=-1))  # (S, E)
    ctx = jnp.concatenate(ctx_rows, axis=0)         # (Bt*S, E) f32

    attn_out = jnp.dot(ctx.astype(jnp.bfloat16), wo_ref[...],
                       preferred_element_type=jnp.float32) + bo_ref[...]

    # --- residual + LayerNorm (attention branch), f32 ------------------------
    y = x + attn_out                                # dropout == identity
    mu = jnp.mean(y, axis=-1, keepdims=True)
    var = jnp.mean((y - mu) ** 2, axis=-1, keepdims=True)
    y = (y - mu) * jax.lax.rsqrt(var + EPS) * g1_ref[...] + be1_ref[...]

    # --- feed-forward network (bf16 operands, f32 accumulation) --------------
    # TODO(synk): for large E, tile the 4E hidden dim with a trailing "arbitrary"
    #             grid axis + f32 accumulator so w1/w2 fit v7x's 64 MiB VMEM.
    h1 = jnp.dot(y.astype(jnp.bfloat16), w1_ref[...],
                 preferred_element_type=jnp.float32) + b1_ref[...]
    h1 = jnp.maximum(h1, 0.0)
    ff = jnp.dot(h1.astype(jnp.bfloat16), w2_ref[...],
                 preferred_element_type=jnp.float32) + b2_ref[...]

    # --- residual + LayerNorm (FFN branch), f32 -------------------------------
    z = y + ff
    mu2 = jnp.mean(z, axis=-1, keepdims=True)
    var2 = jnp.mean((z - mu2) ** 2, axis=-1, keepdims=True)
    out_ref[...] = (z - mu2) * jax.lax.rsqrt(var2 + EPS) * g2_ref[...] + be2_ref[...]


def _prepare_params(p):
    """Fuse QKV and cast matmul weights to bf16 (biases / LN params stay f32)."""
    return {
        "wqkv": jnp.concatenate([p["wq"], p["wk"], p["wv"]], axis=1).astype(jnp.bfloat16),
        "bqkv": jnp.concatenate([p["bq"], p["bk"], p["bv"]], axis=1),
        "wo": p["wo"].astype(jnp.bfloat16), "bo": p["bo"],
        "g1": p["g1"], "be1": p["be1"],
        "w1": p["w1"].astype(jnp.bfloat16), "b1": p["b1"],
        "w2": p["w2"].astype(jnp.bfloat16), "b2": p["b2"],
        "g2": p["g2"], "be2": p["be2"],
    }


def _pick_batch_block(B, max_bt=8):
    bt = 1
    for c in range(1, min(B, max_bt) + 1):
        if B % c == 0:
            bt = c
    return bt


def transformer_encoder_block(x, params, num_heads, *, batch_block=None):
    B, S, E = x.shape
    assert E % num_heads == 0, "emb_dim must be divisible by num_heads"
    hidden = params["w1"].shape[1]
    fused = _prepare_params(params)

    bt = _pick_batch_block(B) if batch_block is None else batch_block
    assert B % bt == 0

    in_specs = [pl.BlockSpec((bt * S, E), lambda i: (i, 0))]
    args = [x.reshape(B * S, E)]
    for name in FUSED_PARAM_NAMES:
        a = fused[name]
        in_specs.append(pl.BlockSpec(a.shape, lambda i: (0, 0)))
        args.append(a)

    H, hd = num_heads, E // num_heads
    flops = int(2 * B * S * E * (3 * E)            # fused QKV projection
                + 2 * B * H * S * S * hd * 2       # attention matmuls
                + 2 * B * S * E * E                # output projection
                + 2 * B * S * E * hidden * 2)      # FFN
    transcendentals = int(B * H * S * S + 4 * B * S)
    bytes_accessed = int(x.size * 4 + B * S * E * 4
                         + sum(int(a.size) * a.dtype.itemsize for a in fused.values()))

    kernel = functools.partial(encoder_block_kernel, num_heads=num_heads,
                               seq_len=S, batch_block=bt)
    out2d = pl.pallas_call(
        kernel,
        out_shape=jax.ShapeDtypeStruct((B * S, E), jnp.float32),
        grid_spec=pltpu.PrefetchScalarGridSpec(
            num_scalar_prefetch=0,
            grid=(B // bt,),
            in_specs=in_specs,
            out_specs=pl.BlockSpec((bt * S, E), lambda i: (i, 0)),
        ),
        compiler_params=pltpu.CompilerParams(
            dimension_semantics=("parallel",),
            vmem_limit_bytes=48 * 1024 * 1024,
        ),
        cost_estimate=pl.CostEstimate(flops=flops,
                                      transcendentals=transcendentals,
                                      bytes_accessed=bytes_accessed),
    )(*args)
    return out2d.reshape(B, S, E)


# ---------------------------- pure-JAX reference (f32) ----------------------------
def reference_forward(x, p, num_heads):
    B, S, E = x.shape
    hd = E // num_heads

    def ln(a, g, b):
        mu = jnp.mean(a, axis=-1, keepdims=True)
        var = jnp.mean((a - mu) ** 2, axis=-1, keepdims=True)
        return (a - mu) / jnp.sqrt(var + EPS) * g + b

    q = (x @ p["wq"] + p["bq"]).reshape(B, S, num_heads, hd).transpose(0, 2, 1, 3)
    k = (x @ p["wk"] + p["bk"]).reshape(B, S, num_heads, hd).transpose(0, 2, 1, 3)
    v = (x @ p["wv"] + p["bv"]).reshape(B, S, num_heads, hd).transpose(0, 2, 1, 3)
    e = jnp.einsum("bhqd,bhkd->bhqk", q, k) / math.sqrt(hd)
    attn = jax.nn.softmax(e, axis=-1)
    ctx = jnp.einsum("bhqk,bhkd->bhqd", attn, v).transpose(0, 2, 1, 3).reshape(B, S, E)
    attn_out = ctx @ p["wo"] + p["bo"]
    y = ln(x + attn_out, p["g1"], p["be1"])
    ff = jnp.maximum(y @ p["w1"] + p["b1"], 0.0) @ p["w2"] + p["b2"]
    return ln(y + ff, p["g2"], p["be2"])


def init_params(key, emb_dim, ff_expansion):
    hidden = emb_dim * ff_expansion

    def linear_init(k, fan_in, fan_out):
        kw, kb = jax.random.split(k)
        bound = 1.0 / math.sqrt(fan_in)
        w = jax.random.uniform(kw, (fan_in, fan_out), jnp.float32, -bound, bound)
        b = jax.random.uniform(kb, (1, fan_out), jnp.float32, -bound, bound)
        return w, b

    keys = jax.random.split(key, 6)
    p = {}
    p["wq"], p["bq"] = linear_init(keys[0], emb_dim, emb_dim)
    p["wk"], p["bk"] = linear_init(keys[1], emb_dim, emb_dim)
    p["wv"], p["bv"] = linear_init(keys[2], emb_dim, emb_dim)
    p["wo"], p["bo"] = linear_init(keys[3], emb_dim, emb_dim)
    p["w1"], p["b1"] = linear_init(keys[4], emb_dim, hidden)
    p["w2"], p["b2"] = linear_init(keys[5], hidden, emb_dim)
    p["g1"] = jnp.ones((1, emb_dim), jnp.float32)
    p["be1"] = jnp.zeros((1, emb_dim), jnp.float32)
    p["g2"] = jnp.ones((1, emb_dim), jnp.float32)
    p["be2"] = jnp.zeros((1, emb_dim), jnp.float32)
    return p


if __name__ == "__main__":
    B, S, E = 2, 8, 32          # batch, seq, emb_dim
    n_heads, ff_expansion = 4, 4

    root = jax.random.PRNGKey(0)
    kx, kp = jax.random.split(root)
    x = jax.random.normal(kx, (B, S, E), jnp.float32)
    params = init_params(kp, E, ff_expansion)

    out = transformer_encoder_block(x, params, n_heads)
    out = jax.block_until_ready(out)

    ref = reference_forward(x, params, n_heads)
    assert out.shape == (B, S, E)
    # bf16 matmul operands + approx reciprocal -> loose-but-meaningful tolerance vs f32 ref.
    assert jnp.allclose(out, ref, atol=5e-2, rtol=5e-2), "mismatch vs reference"

    print("KERNEL_OK")
</pallas_src>

<mosaic_0001>
module attributes {stable_mosaic.version = 11 : i64} {
  func.func @encoder_block_kernel(%arg0: i32, %arg1: memref<16x32xf32, #tpu.memory_space<vmem>>, %arg2: memref<32x96xbf16, #tpu.memory_space<vmem>>, %arg3: memref<1x96xf32, #tpu.memory_space<vmem>>, %arg4: memref<32x32xbf16, #tpu.memory_space<vmem>>, %arg5: memref<1x32xf32, #tpu.memory_space<vmem>>, %arg6: memref<1x32xf32, #tpu.memory_space<vmem>>, %arg7: memref<1x32xf32, #tpu.memory_space<vmem>>, %arg8: memref<32x128xbf16, #tpu.memory_space<vmem>>, %arg9: memref<1x128xf32, #tpu.memory_space<vmem>>, %arg10: memref<128x32xbf16, #tpu.memory_space<vmem>>, %arg11: memref<1x32xf32, #tpu.memory_space<vmem>>, %arg12: memref<1x32xf32, #tpu.memory_space<vmem>>, %arg13: memref<1x32xf32, #tpu.memory_space<vmem>>, %arg14: memref<16x32xf32, #tpu.memory_space<vmem>>) attributes {dimension_semantics = [#tpu.dimension_semantics<parallel>], iteration_bounds = array<i64: 1>, scalar_prefetch = 0 : i64, scratch_operands = 0 : i64, tpu.core_type = #tpu.core_type<tc>, window_params = [{transform_indices = @transform_0, window_bounds = array<i64: 16, 32>}, {pipeline_mode = #tpu.pipeline_mode<synchronous>, transform_indices = @transform_1, window_bounds = array<i64: 32, 96>}, {pipeline_mode = #tpu.pipeline_mode<synchronous>, transform_indices = @transform_2, window_bounds = array<i64: 1, 96>}, {pipeline_mode = #tpu.pipeline_mode<synchronous>, transform_indices = @transform_3, window_bounds = array<i64: 32, 32>}, {pipeline_mode = #tpu.pipeline_mode<synchronous>, transform_indices = @transform_4, window_bounds = array<i64: 1, 32>}, {pipeline_mode = #tpu.pipeline_mode<synchronous>, transform_indices = @transform_5, window_bounds = array<i64: 1, 32>}, {pipeline_mode = #tpu.pipeline_mode<synchronous>, transform_indices = @transform_6, window_bounds = array<i64: 1, 32>}, {pipeline_mode = #tpu.pipeline_mode<synchronous>, transform_indices = @transform_7, window_bounds = array<i64: 32, 128>}, {pipeline_mode = #tpu.pipeline_mode<synchronous>, transform_indices = @transform_8, window_bounds = array<i64: 1, 128>}, {pipeline_mode = #tpu.pipeline_mode<synchronous>, transform_indices = @transform_9, window_bounds = array<i64: 128, 32>}, {pipeline_mode = #tpu.pipeline_mode<synchronous>, transform_indices = @transform_10, window_bounds = array<i64: 1, 32>}, {pipeline_mode = #tpu.pipeline_mode<synchronous>, transform_indices = @transform_11, window_bounds = array<i64: 1, 32>}, {pipeline_mode = #tpu.pipeline_mode<synchronous>, transform_indices = @transform_12, window_bounds = array<i64: 1, 32>}, {transform_indices = @transform_13, window_bounds = array<i64: 16, 32>}]} {
    %c0 = arith.constant 0 : index
    %c0_0 = arith.constant 0 : index
    %0 = vector.load %arg1[%c0, %c0_0] : memref<16x32xf32, #tpu.memory_space<vmem>>, vector<16x32xf32>
    %1 = arith.truncf %0 : vector<16x32xf32> to vector<16x32xbf16>
    %c0_1 = arith.constant 0 : index
    %c0_2 = arith.constant 0 : index
    %2 = vector.load %arg2[%c0_1, %c0_2] : memref<32x96xbf16, #tpu.memory_space<vmem>>, vector<32x96xbf16>
    %cst = arith.constant dense<0.000000e+00> : vector<16x96xf32>
    %3 = tpu.matmul %1, %2, %cst {dimension_numbers = #tpu.dot_dimension_numbers<[1], [0], [0], [1], [0, 0, 1, 1], [], []>} : vector<16x32xbf16>, vector<32x96xbf16>, vector<16x96xf32> -> vector<16x96xf32>
    %c0_3 = arith.constant 0 : index
    %c0_4 = arith.constant 0 : index
    %4 = vector.load %arg3[%c0_3, %c0_4] : memref<1x96xf32, #tpu.memory_space<vmem>>, vector<1x96xf32>
    %5 = vector.broadcast %4 : vector<1x96xf32> to vector<16x96xf32>
    %6 = arith.addf %3, %5 : vector<16x96xf32>
    %7 = vector.extract_strided_slice %6 {offsets = [0, 0], sizes = [16, 32], strides = [1, 1]} : vector<16x96xf32> to vector<16x32xf32>
    %cst_5 = arith.constant 0.353553385 : f32
    %8 = vector.broadcast %cst_5 : f32 to vector<16x32xf32>
    %9 = arith.mulf %7, %8 : vector<16x32xf32>
    %10 = vector.extract_strided_slice %6 {offsets = [0, 32], sizes = [16, 32], strides = [1, 1]} : vector<16x96xf32> to vector<16x32xf32>
    %11 = vector.extract_strided_slice %6 {offsets = [0, 64], sizes = [16, 32], strides = [1, 1]} : vector<16x96xf32> to vector<16x32xf32>
    %12 = vector.extract_strided_slice %9 {offsets = [0, 0], sizes = [8, 32], strides = [1, 1]} : vector<16x32xf32> to vector<8x32xf32>
    %13 = vector.extract_strided_slice %12 {offsets = [0, 0], sizes = [8, 8], strides = [1, 1]} : vector<8x32xf32> to vector<8x8xf32>
    %14 = vector.extract_strided_slice %12 {offsets = [0, 8], sizes = [8, 8], strides = [1, 1]} : vector<8x32xf32> to vector<8x8xf32>
    %15 = vector.extract_strided_slice %12 {offsets = [0, 16], sizes = [8, 8], strides = [1, 1]} : vector<8x32xf32> to vector<8x8xf32>
    %16 = vector.extract_strided_slice %12 {offsets = [0, 24], sizes = [8, 8], strides = [1, 1]} : vector<8x32xf32> to vector<8x8xf32>
    %17 = vector.shape_cast %13 : vector<8x8xf32> to vector<1x8x8xf32>
    %18 = vector.shape_cast %14 : vector<8x8xf32> to vector<1x8x8xf32>
    %19 = vector.shape_cast %15 : vector<8x8xf32> to vector<1x8x8xf32>
    %20 = vector.shape_cast %16 : vector<8x8xf32> to vector<1x8x8xf32>
    %21 = tpu.concatenate %17, %18, %19, %20 in 0 : vector<1x8x8xf32>, vector<1x8x8xf32>, vector<1x8x8xf32>, vector<1x8x8xf32> -> vector<4x8x8xf32>
    %22 = arith.truncf %21 : vector<4x8x8xf32> to vector<4x8x8xbf16>
    %23 = vector.extract_strided_slice %10 {offsets = [0, 0], sizes = [8, 32], strides = [1, 1]} : vector<16x32xf32> to vector<8x32xf32>
    %24 = vector.extract_strided_slice %23 {offsets = [0, 0], sizes = [8, 8], strides = [1, 1]} : vector<8x32xf32> to vector<8x8xf32>
    %25 = vector.extract_strided_slice %23 {offsets = [0, 8], sizes = [8, 8], strides = [1, 1]} : vector<8x32xf32> to vector<8x8xf32>
    %26 = vector.extract_strided_slice %23 {offsets = [0, 16], sizes = [8, 8], strides = [1, 1]} : vector<8x32xf32> to vector<8x8xf32>
    %27 = vector.extract_strided_slice %23 {offsets = [0, 24], sizes = [8, 8], strides = [1, 1]} : vector<8x32xf32> to vector<8x8xf32>
    %28 = vector.shape_cast %24 : vector<8x8xf32> to vector<1x8x8xf32>
    %29 = vector.shape_cast %25 : vector<8x8xf32> to vector<1x8x8xf32>
    %30 = vector.shape_cast %26 : vector<8x8xf32> to vector<1x8x8xf32>
    %31 = vector.shape_cast %27 : vector<8x8xf32> to vector<1x8x8xf32>
    %32 = tpu.concatenate %28, %29, %30, %31 in 0 : vector<1x8x8xf32>, vector<1x8x8xf32>, vector<1x8x8xf32>, vector<1x8x8xf32> -> vector<4x8x8xf32>
    %33 = arith.truncf %32 : vector<4x8x8xf32> to vector<4x8x8xbf16>
    %34 = vector.extract_strided_slice %11 {offsets = [0, 0], sizes = [8, 32], strides = [1, 1]} : vector<16x32xf32> to vector<8x32xf32>
    %35 = vector.extract_strided_slice %34 {offsets = [0, 0], sizes = [8, 8], strides = [1, 1]} : vector<8x32xf32> to vector<8x8xf32>
    %36 = vector.extract_strided_slice %34 {offsets = [0, 8], sizes = [8, 8], strides = [1, 1]} : vector<8x32xf32> to vector<8x8xf32>
    %37 = vector.extract_strided_slice %34 {offsets = [0, 16], sizes = [8, 8], strides = [1, 1]} : vector<8x32xf32> to vector<8x8xf32>
    %38 = vector.extract_strided_slice %34 {offsets = [0, 24], sizes = [8, 8], strides = [1, 1]} : vector<8x32xf32> to vector<8x8xf32>
    %39 = vector.shape_cast %35 : vector<8x8xf32> to vector<1x8x8xf32>
    %40 = vector.shape_cast %36 : vector<8x8xf32> to vector<1x8x8xf32>
    %41 = vector.shape_cast %37 : vector<8x8xf32> to vector<1x8x8xf32>
    %42 = vector.shape_cast %38 : vector<8x8xf32> to vector<1x8x8xf32>
    %43 = tpu.concatenate %39, %40, %41, %42 in 0 : vector<1x8x8xf32>, vector<1x8x8xf32>, vector<1x8x8xf32>, vector<1x8x8xf32> -> vector<4x8x8xf32>
    %44 = arith.truncf %43 : vector<4x8x8xf32> to vector<4x8x8xbf16>
    "tpu.trace_start"() <{level = 10 : i32, message = "hqd,hkd->hqk"}> : () -> ()
    %cst_6 = arith.constant dense<0.000000e+00> : vector<4x8x8xf32>
    %45 = tpu.matmul %22, %33, %cst_6 {dimension_numbers = #tpu.dot_dimension_numbers<[2], [2], [1], [1], [0, 0, 0, 1, 1, 1], [0], [0]>} : vector<4x8x8xbf16>, vector<4x8x8xbf16>, vector<4x8x8xf32> -> vector<4x8x8xf32>
    "tpu.trace_stop"() : () -> ()
    %cst_7 = arith.constant dense<0xFF800000> : vector<4x8xf32>
    %46 = vector.multi_reduction <maximumf>, %45, %cst_7 [2] : vector<4x8x8xf32> to vector<4x8xf32>
    %47 = vector.shape_cast %46 : vector<4x8xf32> to vector<4x8x1xf32>
    %48 = vector.broadcast %47 : vector<4x8x1xf32> to vector<4x8x8xf32>
    %49 = arith.subf %45, %48 : vector<4x8x8xf32>
    %50 = math.exp %49 : vector<4x8x8xf32>
    %cst_8 = arith.constant dense<0.000000e+00> : vector<4x8xf32>
    %51 = vector.multi_reduction <add>, %50, %cst_8 [2] : vector<4x8x8xf32> to vector<4x8xf32>
    %52 = vector.shape_cast %51 : vector<4x8xf32> to vector<4x8x1xf32>
    %53 = tpu.reciprocal %52 {approx = true} : vector<4x8x1xf32> -> vector<4x8x1xf32>
    %54 = vector.broadcast %53 : vector<4x8x1xf32> to vector<4x8x8xf32>
    %55 = arith.mulf %50, %54 : vector<4x8x8xf32>
    %56 = arith.truncf %55 : vector<4x8x8xf32> to vector<4x8x8xbf16>
    "tpu.trace_start"() <{level = 10 : i32, message = "hqk,hkd->hqd"}> : () -> ()
    %cst_9 = arith.constant dense<0.000000e+00> : vector<4x8x8xf32>
    %57 = tpu.matmul %56, %44, %cst_9 {dimension_numbers = #tpu.dot_dimension_numbers<[2], [1], [1], [2], [0, 0, 0, 1, 1, 2], [0], [0]>} : vector<4x8x8xbf16>, vector<4x8x8xbf16>, vector<4x8x8xf32> -> vector<4x8x8xf32>
    "tpu.trace_stop"() : () -> ()
    %58 = vector.extract_strided_slice %57 {offsets = [0, 0, 0], sizes = [1, 8, 8], strides = [1, 1, 1]} : vector<4x8x8xf32> to vector<1x8x8xf32>
    %59 = vector.shape_cast %58 : vector<1x8x8xf32> to vector<8x8xf32>
    %60 = vector.extract_strided_slice %57 {offsets = [1, 0, 0], sizes = [1, 8, 8], strides = [1, 1, 1]} : vector<4x8x8xf32> to vector<1x8x8xf32>
    %61 = vector.shape_cast %60 : vector<1x8x8xf32> to vector<8x8xf32>
    %62 = vector.extract_strided_slice %57 {offsets = [2, 0, 0], sizes = [1, 8, 8], strides = [1, 1, 1]} : vector<4x8x8xf32> to vector<1x8x8xf32>
    %63 = vector.shape_cast %62 : vector<1x8x8xf32> to vector<8x8xf32>
    %64 = vector.extract_strided_slice %57 {offsets = [3, 0, 0], sizes = [1, 8, 8], strides = [1, 1, 1]} : vector<4x8x8xf32> to vector<1x8x8xf32>
    %65 = vector.shape_cast %64 : vector<1x8x8xf32> to vector<8x8xf32>
    %66 = tpu.concatenate %59, %61, %63, %65 in 1 : vector<8x8xf32>, vector<8x8xf32>, vector<8x8xf32>, vector<8x8xf32> -> vector<8x32xf32>
    %67 = vector.extract_strided_slice %9 {offsets = [8, 0], sizes = [8, 32], strides = [1, 1]} : vector<16x32xf32> to vector<8x32xf32>
    %68 = vector.extract_strided_slice %67 {offsets = [0, 0], sizes = [8, 8], strides = [1, 1]} : vector<8x32xf32> to vector<8x8xf32>
    %69 = vector.extract_strided_slice %67 {offsets = [0, 8], sizes = [8, 8], strides = [1, 1]} : vector<8x32xf32> to vector<8x8xf32>
    %70 = vector.extract_strided_slice %67 {offsets = [0, 16], sizes = [8, 8], strides = [1, 1]} : vector<8x32xf32> to vector<8x8xf32>
    %71 = vector.extract_strided_slice %67 {offsets = [0, 24], sizes = [8, 8], strides = [1, 1]} : vector<8x32xf32> to vector<8x8xf32>
    %72 = vector.shape_cast %68 : vector<8x8xf32> to vector<1x8x8xf32>
    %73 = vector.shape_cast %69 : vector<8x8xf32> to vector<1x8x8xf32>
    %74 = vector.shape_cast %70 : vector<8x8xf32> to vector<1x8x8xf32>
    %75 = vector.shape_cast %71 : vector<8x8xf32> to vector<1x8x8xf32>
    %76 = tpu.concatenate %72, %73, %74, %75 in 0 : vector<1x8x8xf32>, vector<1x8x8xf32>, vector<1x8x8xf32>, vector<1x8x8xf32> -> vector<4x8x8xf32>
    %77 = arith.truncf %76 : vector<4x8x8xf32> to vector<4x8x8xbf16>
    %78 = vector.extract_strided_slice %10 {offsets = [8, 0], sizes = [8, 32], strides = [1, 1]} : vector<16x32xf32> to vector<8x32xf32>
    %79 = vector.extract_strided_slice %78 {offsets = [0, 0], sizes = [8, 8], strides = [1, 1]} : vector<8x32xf32> to vector<8x8xf32>
    %80 = vector.extract_strided_slice %78 {offsets = [0, 8], sizes = [8, 8], strides = [1, 1]} : vector<8x32xf32> to vector<8x8xf32>
    %81 = vector.extract_strided_slice %78 {offsets = [0, 16], sizes = [8, 8], strides = [1, 1]} : vector<8x32xf32> to vector<8x8xf32>
    %82 = vector.extract_strided_slice %78 {offsets = [0, 24], sizes = [8, 8], strides = [1, 1]} : vector<8x32xf32> to vector<8x8xf32>
    %83 = vector.shape_cast %79 : vector<8x8xf32> to vector<1x8x8xf32>
    %84 = vector.shape_cast %80 : vector<8x8xf32> to vector<1x8x8xf32>
    %85 = vector.shape_cast %81 : vector<8x8xf32> to vector<1x8x8xf32>
    %86 = vector.shape_cast %82 : vector<8x8xf32> to vector<1x8x8xf32>
    %87 = tpu.concatenate %83, %84, %85, %86 in 0 : vector<1x8x8xf32>, vector<1x8x8xf32>, vector<1x8x8xf32>, vector<1x8x8xf32> -> vector<4x8x8xf32>
    %88 = arith.truncf %87 : vector<4x8x8xf32> to vector<4x8x8xbf16>
    %89 = vector.extract_strided_slice %11 {offsets = [8, 0], sizes = [8, 32], strides = [1, 1]} : vector<16x32xf32> to vector<8x32xf32>
    %90 = vector.extract_strided_slice %89 {offsets = [0, 0], sizes = [8, 8], strides = [1, 1]} : vector<8x32xf32> to vector<8x8xf32>
    %91 = vector.extract_strided_slice %89 {offsets = [0, 8], sizes = [8, 8], strides = [1, 1]} : vector<8x32xf32> to vector<8x8xf32>
    %92 = vector.extract_strided_slice %89 {offsets = [0, 16], sizes = [8, 8], strides = [1, 1]} : vector<8x32xf32> to vector<8x8xf32>
    %93 = vector.extract_strided_slice %89 {offsets = [0, 24], sizes = [8, 8], strides = [1, 1]} : vector<8x32xf32> to vector<8x8xf32>
    %94 = vector.shape_cast %90 : vector<8x8xf32> to vector<1x8x8xf32>
    %95 = vector.shape_cast %91 : vector<8x8xf32> to vector<1x8x8xf32>
    %96 = vector.shape_cast %92 : vector<8x8xf32> to vector<1x8x8xf32>
    %97 = vector.shape_cast %93 : vector<8x8xf32> to vector<1x8x8xf32>
    %98 = tpu.concatenate %94, %95, %96, %97 in 0 : vector<1x8x8xf32>, vector<1x8x8xf32>, vector<1x8x8xf32>, vector<1x8x8xf32> -> vector<4x8x8xf32>
    %99 = arith.truncf %98 : vector<4x8x8xf32> to vector<4x8x8xbf16>
    "tpu.trace_start"() <{level = 10 : i32, message = "hqd,hkd->hqk"}> : () -> ()
    %cst_10 = arith.constant dense<0.000000e+00> : vector<4x8x8xf32>
    %100 = tpu.matmul %77, %88, %cst_10 {dimension_numbers = #tpu.dot_dimension_numbers<[2], [2], [1], [1], [0, 0, 0, 1, 1, 1], [0], [0]>} : vector<4x8x8xbf16>, vector<4x8x8xbf16>, vector<4x8x8xf32> -> vector<4x8x8xf32>
    "tpu.trace_stop"() : () -> ()
    %cst_11 = arith.constant dense<0xFF800000> : vector<4x8xf32>
    %101 = vector.multi_reduction <maximumf>, %100, %cst_11 [2] : vector<4x8x8xf32> to vector<4x8xf32>
    %102 = vector.shape_cast %101 : vector<4x8xf32> to vector<4x8x1xf32>
    %103 = vector.broadcast %102 : vector<4x8x1xf32> to vector<4x8x8xf32>
    %104 = arith.subf %100, %103 : vector<4x8x8xf32>
    %105 = math.exp %104 : vector<4x8x8xf32>
    %cst_12 = arith.constant dense<0.000000e+00> : vector<4x8xf32>
    %106 = vector.multi_reduction <add>, %105, %cst_12 [2] : vector<4x8x8xf32> to vector<4x8xf32>
    %107 = vector.shape_cast %106 : vector<4x8xf32> to vector<4x8x1xf32>
    %108 = tpu.reciprocal %107 {approx = true} : vector<4x8x1xf32> -> vector<4x8x1xf32>
    %109 = vector.broadcast %108 : vector<4x8x1xf32> to vector<4x8x8xf32>
    %110 = arith.mulf %105, %109 : vector<4x8x8xf32>
    %111 = arith.truncf %110 : vector<4x8x8xf32> to vector<4x8x8xbf16>
    "tpu.trace_start"() <{level = 10 : i32, message = "hqk,hkd->hqd"}> : () -> ()
    %cst_13 = arith.constant dense<0.000000e+00> : vector<4x8x8xf32>
    %112 = tpu.matmul %111, %99, %cst_13 {dimension_numbers = #tpu.dot_dimension_numbers<[2], [1], [1], [2], [0, 0, 0, 1, 1, 2], [0], [0]>} : vector<4x8x8xbf16>, vector<4x8x8xbf16>, vector<4x8x8xf32> -> vector<4x8x8xf32>
    "tpu.trace_stop"() : () -> ()
    %113 = vector.extract_strided_slice %112 {offsets = [0, 0, 0], sizes = [1, 8, 8], strides = [1, 1, 1]} : vector<4x8x8xf32> to vector<1x8x8xf32>
    %114 = vector.shape_cast %113 : vector<1x8x8xf32> to vector<8x8xf32>
    %115 = vector.extract_strided_slice %112 {offsets = [1, 0, 0], sizes = [1, 8, 8], strides = [1, 1, 1]} : vector<4x8x8xf32> to vector<1x8x8xf32>
    %116 = vector.shape_cast %115 : vector<1x8x8xf32> to vector<8x8xf32>
    %117 = vector.extract_strided_slice %112 {offsets = [2, 0, 0], sizes = [1, 8, 8], strides = [1, 1, 1]} : vector<4x8x8xf32> to vector<1x8x8xf32>
    %118 = vector.shape_cast %117 : vector<1x8x8xf32> to vector<8x8xf32>
    %119 = vector.extract_strided_slice %112 {offsets = [3, 0, 0], sizes = [1, 8, 8], strides = [1, 1, 1]} : vector<4x8x8xf32> to vector<1x8x8xf32>
    %120 = vector.shape_cast %119 : vector<1x8x8xf32> to vector<8x8xf32>
    %121 = tpu.concatenate %114, %116, %118, %120 in 1 : vector<8x8xf32>, vector<8x8xf32>, vector<8x8xf32>, vector<8x8xf32> -> vector<8x32xf32>
    %122 = tpu.concatenate %66, %121 in 0 : vector<8x32xf32>, vector<8x32xf32> -> vector<16x32xf32>
    %123 = arith.truncf %122 : vector<16x32xf32> to vector<16x32xbf16>
    %c0_14 = arith.constant 0 : index
    %c0_15 = arith.constant 0 : index
    %124 = vector.load %arg4[%c0_14, %c0_15] : memref<32x32xbf16, #tpu.memory_space<vmem>>, vector<32x32xbf16>
    %cst_16 = arith.constant dense<0.000000e+00> : vector<16x32xf32>
    %125 = tpu.matmul %123, %124, %cst_16 {dimension_numbers = #tpu.dot_dimension_numbers<[1], [0], [0], [1], [0, 0, 1, 1], [], []>} : vector<16x32xbf16>, vector<32x32xbf16>, vector<16x32xf32> -> vector<16x32xf32>
    %c0_17 = arith.constant 0 : index
    %c0_18 = arith.constant 0 : index
    %126 = vector.load %arg5[%c0_17, %c0_18] : memref<1x32xf32, #tpu.memory_space<vmem>>, vector<1x32xf32>
    %127 = vector.broadcast %126 : vector<1x32xf32> to vector<16x32xf32>
    %128 = arith.addf %125, %127 : vector<16x32xf32>
    %129 = arith.addf %0, %128 : vector<16x32xf32>
    %cst_19 = arith.constant dense<0.000000e+00> : vector<16xf32>
    %130 = vector.multi_reduction <add>, %129, %cst_19 [1] : vector<16x32xf32> to vector<16xf32>
    %131 = vector.shape_cast %130 : vector<16xf32> to vector<16x1xf32>
    %cst_20 = arith.constant 3.200000e+01 : f32
    %132 = vector.broadcast %cst_20 : f32 to vector<16x1xf32>
    %133 = arith.divf %131, %132 : vector<16x1xf32>
    %134 = vector.broadcast %133 : vector<16x1xf32> to vector<16x32xf32>
    %135 = arith.subf %129, %134 : vector<16x32xf32>
    %136 = arith.mulf %135, %135 : vector<16x32xf32>
    %cst_21 = arith.constant dense<0.000000e+00> : vector<16xf32>
    %137 = vector.multi_reduction <add>, %136, %cst_21 [1] : vector<16x32xf32> to vector<16xf32>
    %138 = vector.shape_cast %137 : vector<16xf32> to vector<16x1xf32>
    %cst_22 = arith.constant 3.200000e+01 : f32
    %139 = vector.broadcast %cst_22 : f32 to vector<16x1xf32>
    %140 = arith.divf %138, %139 : vector<16x1xf32>
    %141 = vector.broadcast %133 : vector<16x1xf32> to vector<16x32xf32>
    %142 = arith.subf %129, %141 : vector<16x32xf32>
    %cst_23 = arith.constant 9.99999974E-6 : f32
    %143 = vector.broadcast %cst_23 : f32 to vector<16x1xf32>
    %144 = arith.addf %140, %143 : vector<16x1xf32>
    %145 = math.rsqrt %144 : vector<16x1xf32>
    %146 = vector.broadcast %145 : vector<16x1xf32> to vector<16x32xf32>
    %147 = arith.mulf %142, %146 : vector<16x32xf32>
    %c0_24 = arith.constant 0 : index
    %c0_25 = arith.constant 0 : index
    %148 = vector.load %arg6[%c0_24, %c0_25] : memref<1x32xf32, #tpu.memory_space<vmem>>, vector<1x32xf32>
    %149 = vector.broadcast %148 : vector<1x32xf32> to vector<16x32xf32>
    %150 = arith.mulf %147, %149 : vector<16x32xf32>
    %c0_26 = arith.constant 0 : index
    %c0_27 = arith.constant 0 : index
    %151 = vector.load %arg7[%c0_26, %c0_27] : memref<1x32xf32, #tpu.memory_space<vmem>>, vector<1x32xf32>
    %152 = vector.broadcast %151 : vector<1x32xf32> to vector<16x32xf32>
    %153 = arith.addf %150, %152 : vector<16x32xf32>
    %154 = arith.truncf %153 : vector<16x32xf32> to vector<16x32xbf16>
    %c0_28 = arith.constant 0 : index
    %c0_29 = arith.constant 0 : index
    %155 = vector.load %arg8[%c0_28, %c0_29] : memref<32x128xbf16, #tpu.memory_space<vmem>>, vector<32x128xbf16>
    %cst_30 = arith.constant dense<0.000000e+00> : vector<16x128xf32>
    %156 = tpu.matmul %154, %155, %cst_30 {dimension_numbers = #tpu.dot_dimension_numbers<[1], [0], [0], [1], [0, 0, 1, 1], [], []>} : vector<16x32xbf16>, vector<32x128xbf16>, vector<16x128xf32> -> vector<16x128xf32>
    %c0_31 = arith.constant 0 : index
    %c0_32 = arith.constant 0 : index
    %157 = vector.load %arg9[%c0_31, %c0_32] : memref<1x128xf32, #tpu.memory_space<vmem>>, vector<1x128xf32>
    %158 = vector.broadcast %157 : vector<1x128xf32> to vector<16x128xf32>
    %159 = arith.addf %156, %158 : vector<16x128xf32>
    %cst_33 = arith.constant 0.000000e+00 : f32
    %160 = vector.broadcast %cst_33 : f32 to vector<16x128xf32>
    %161 = arith.maximumf %159, %160 : vector<16x128xf32>
    %162 = arith.truncf %161 : vector<16x128xf32> to vector<16x128xbf16>
    %c0_34 = arith.constant 0 : index
    %c0_35 = arith.constant 0 : index
    %163 = vector.load %arg10[%c0_34, %c0_35] : memref<128x32xbf16, #tpu.memory_space<vmem>>, vector<128x32xbf16>
    %cst_36 = arith.constant dense<0.000000e+00> : vector<16x32xf32>
    %164 = tpu.matmul %162, %163, %cst_36 {dimension_numbers = #tpu.dot_dimension_numbers<[1], [0], [0], [1], [0, 0, 1, 1], [], []>} : vector<16x128xbf16>, vector<128x32xbf16>, vector<16x32xf32> -> vector<16x32xf32>
    %c0_37 = arith.constant 0 : index
    %c0_38 = arith.constant 0 : index
    %165 = vector.load %arg11[%c0_37, %c0_38] : memref<1x32xf32, #tpu.memory_space<vmem>>, vector<1x32xf32>
    %166 = vector.broadcast %165 : vector<1x32xf32> to vector<16x32xf32>
    %167 = arith.addf %164, %166 : vector<16x32xf32>
    %168 = arith.addf %153, %167 : vector<16x32xf32>
    %cst_39 = arith.constant dense<0.000000e+00> : vector<16xf32>
    %169 = vector.multi_reduction <add>, %168, %cst_39 [1] : vector<16x32xf32> to vector<16xf32>
    %170 = vector.shape_cast %169 : vector<16xf32> to vector<16x1xf32>
    %cst_40 = arith.constant 3.200000e+01 : f32
    %171 = vector.broadcast %cst_40 : f32 to vector<16x1xf32>
    %172 = arith.divf %170, %171 : vector<16x1xf32>
    %173 = vector.broadcast %172 : vector<16x1xf32> to vector<16x32xf32>
    %174 = arith.subf %168, %173 : vector<16x32xf32>
    %175 = arith.mulf %174, %174 : vector<16x32xf32>
    %cst_41 = arith.constant dense<0.000000e+00> : vector<16xf32>
    %176 = vector.multi_reduction <add>, %175, %cst_41 [1] : vector<16x32xf32> to vector<16xf32>
    %177 = vector.shape_cast %176 : vector<16xf32> to vector<16x1xf32>
    %cst_42 = arith.constant 3.200000e+01 : f32
    %178 = vector.broadcast %cst_42 : f32 to vector<16x1xf32>
    %179 = arith.divf %177, %178 : vector<16x1xf32>
    %180 = vector.broadcast %172 : vector<16x1xf32> to vector<16x32xf32>
    %181 = arith.subf %168, %180 : vector<16x32xf32>
    %cst_43 = arith.constant 9.99999974E-6 : f32
    %182 = vector.broadcast %cst_43 : f32 to vector<16x1xf32>
    %183 = arith.addf %179, %182 : vector<16x1xf32>
    %184 = math.rsqrt %183 : vector<16x1xf32>
    %185 = vector.broadcast %184 : vector<16x1xf32> to vector<16x32xf32>
    %186 = arith.mulf %181, %185 : vector<16x32xf32>
    %c0_44 = arith.constant 0 : index
    %c0_45 = arith.constant 0 : index
    %187 = vector.load %arg12[%c0_44, %c0_45] : memref<1x32xf32, #tpu.memory_space<vmem>>, vector<1x32xf32>
    %188 = vector.broadcast %187 : vector<1x32xf32> to vector<16x32xf32>
    %189 = arith.mulf %186, %188 : vector<16x32xf32>
    %c0_46 = arith.constant 0 : index
    %c0_47 = arith.constant 0 : index
    %190 = vector.load %arg13[%c0_46, %c0_47] : memref<1x32xf32, #tpu.memory_space<vmem>>, vector<1x32xf32>
    %191 = vector.broadcast %190 : vector<1x32xf32> to vector<16x32xf32>
    %192 = arith.addf %189, %191 : vector<16x32xf32>
    %c0_48 = arith.constant 0 : index
    %c0_49 = arith.constant 0 : index
    %193 = vector.load %arg14[%c0_48, %c0_49] : memref<16x32xf32, #tpu.memory_space<vmem>>, vector<16x32xf32>
    tpu.vector_store %arg14[%c0_48, %c0_49], %192 {strides = array<i32>} : memref<16x32xf32, #tpu.memory_space<vmem>>, vector<16x32xf32>,
    return
  }
  func.func @transform_0(%arg0: i32) -> (i32, i32) {
    %c0_i32 = arith.constant 0 : i32
    %c0_i32_0 = arith.constant 0 : i32
    return %arg0, %c0_i32 : i32, i32
  }
  func.func @transform_1(%arg0: i32) -> (i32, i32) {
    %c0_i32 = arith.constant 0 : i32
    %c0_i32_0 = arith.constant 0 : i32
    %c0_i32_1 = arith.constant 0 : i32
    return %c0_i32, %c0_i32_0 : i32, i32
  }
  func.func @transform_2(%arg0: i32) -> (i32, i32) {
    %c0_i32 = arith.constant 0 : i32
    %c0_i32_0 = arith.constant 0 : i32
    %c0_i32_1 = arith.constant 0 : i32
    return %c0_i32, %c0_i32_0 : i32, i32
  }
  func.func @transform_3(%arg0: i32) -> (i32, i32) {
    %c0_i32 = arith.constant 0 : i32
    %c0_i32_0 = arith.constant 0 : i32
    %c0_i32_1 = arith.constant 0 : i32
    return %c0_i32, %c0_i32_0 : i32, i32
  }
  func.func @transform_4(%arg0: i32) -> (i32, i32) {
    %c0_i32 = arith.constant 0 : i32
    %c0_i32_0 = arith.constant 0 : i32
    %c0_i32_1 = arith.constant 0 : i32
    return %c0_i32, %c0_i32_0 : i32, i32
  }
  func.func @transform_5(%arg0: i32) -> (i32, i32) {
    %c0_i32 = arith.constant 0 : i32
    %c0_i32_0 = arith.constant 0 : i32
    %c0_i32_1 = arith.constant 0 : i32
    return %c0_i32, %c0_i32_0 : i32, i32
  }
  func.func @transform_6(%arg0: i32) -> (i32, i32) {
    %c0_i32 = arith.constant 0 : i32
    %c0_i32_0 = arith.constant 0 : i32
    %c0_i32_1 = arith.constant 0 : i32
    return %c0_i32, %c0_i32_0 : i32, i32
  }
  func.func @transform_7(%arg0: i32) -> (i32, i32) {
    %c0_i32 = arith.constant 0 : i32
    %c0_i32_0 = arith.constant 0 : i32
    %c0_i32_1 = arith.constant 0 : i32
    return %c0_i32, %c0_i32_0 : i32, i32
  }
  func.func @transform_8(%arg0: i32) -> (i32, i32) {
    %c0_i32 = arith.constant 0 : i32
    %c0_i32_0 = arith.constant 0 : i32
    %c0_i32_1 = arith.constant 0 : i32
    return %c0_i32, %c0_i32_0 : i32, i32
  }
  func.func @transform_9(%arg0: i32) -> (i32, i32) {
    %c0_i32 = arith.constant 0 : i32
    %c0_i32_0 = arith.constant 0 : i32
    %c0_i32_1 = arith.constant 0 : i32
    return %c0_i32, %c0_i32_0 : i32, i32
  }
  func.func @transform_10(%arg0: i32) -> (i32, i32) {
    %c0_i32 = arith.constant 0 : i32
    %c0_i32_0 = arith.constant 0 : i32
    %c0_i32_1 = arith.constant 0 : i32
    return %c0_i32, %c0_i32_0 : i32, i32
  }
  func.func @transform_11(%arg0: i32) -> (i32, i32) {
    %c0_i32 = arith.constant 0 : i32
    %c0_i32_0 = arith.constant 0 : i32
    %c0_i32_1 = arith.constant 0 : i32
    return %c0_i32, %c0_i32_0 : i32, i32
  }
  func.func @transform_12(%arg0: i32) -> (i32, i32) {
    %c0_i32 = arith.constant 0 : i32
    %c0_i32_0 = arith.constant 0 : i32
    %c0_i32_1 = arith.constant 0 : i32
    return %c0_i32, %c0_i32_0 : i32, i32
  }
  func.func @transform_13(%arg0: i32) -> (i32, i32) {
    %c0_i32 = arith.constant 0 : i32
    %c0_i32_0 = arith.constant 0 : i32
    return %arg0, %c0_i32 : i32, i32
  }
}

</mosaic_0001>

<bundles_post_ra>
// kernel: tpu_custom_call.1
= control target key start
LH: loop header
LB: loop body
LE: loop exit
PB: predicated region body
PF: predicated region fallthrough
CT: control target
= control target key end

     0   :  { %s1444_s0 = inlined_call_operand.vmem [shape: f32[16,32], index: 0, kind: input, shape index: {}]   ;;  %s1445_s1 = inlined_call_operand.vmem [shape: bf16[32,96], index: 1, kind: input, shape index: {}]   ;;  %s1446_s2 = inlined_call_operand.vmem [shape: f32[1,96], index: 2, kind: input, shape index: {}]   ;;  %s1447_s3 = inlined_call_operand.vmem [shape: bf16[32,32], index: 3, kind: input, shape index: {}]   ;;  %s1448_s4 = inlined_call_operand.vmem [shape: f32[1,32], index: 4, kind: input, shape index: {}]   ;;  %s1449_s5 = inlined_call_operand.vmem [shape: f32[1,32], index: 5, kind: input, shape index: {}]   ;;  %s1450_s6 = inlined_call_operand.vmem [shape: f32[1,32], index: 6, kind: input, shape index: {}]   ;;  %s1451_s7 = inlined_call_operand.vmem [shape: bf16[32,128], index: 7, kind: input, shape index: {}]   ;;  %s1452_s8 = inlined_call_operand.vmem [shape: f32[1,128], index: 8, kind: input, shape index: {}]   ;;  %s1453_s9 = inlined_call_operand.vmem [shape: bf16[128,32], index: 9, kind: input, shape index: {}]   ;;  %s1454_s10 = inlined_call_operand.vmem [shape: f32[1,32], index: 10, kind: input, shape index: {}]   ;;  %s1455_s11 = inlined_call_operand.vmem [shape: f32[1,32], index: 11, kind: input, shape index: {}]   ;;  %s1456_s12 = inlined_call_operand.vmem [shape: f32[1,32], index: 12, kind: input, shape index: {}]   ;;  %s1457_s13 = inlined_call_operand.hbm [shape: f32[16,32], index: 13, kind: output, shape index: {}]  }
   0x1   :  { %v1015_v0 = vld [vmem:[%s1445_s1 + $0x8] sm:$0xff]  ;;  %v1014_v1 = vld [vmem:[%s1445_s1] sm:$0xff] }
   0x2   :  { %v1220_v2 = vld [vmem:[%s1444_s0] sm:$0xff]  ;;  %v1225_v3 = vld [vmem:[%s1444_s0 + $0x8] sm:$0xff]  ;;  %79 = vmatpush.bf16.msra.mxu0 %v1015_v0 }
   0x3   :  { %18 = vsyncpa [#allocation3], 0  ;;  %v48_v4 = vpack.c.bf16 %v1225_v3, %v1220_v2  ;;  %vm69_vm0 = vcmask 261120   ;;  %v1233_v5 = vld [vmem:[%s1446_s2] ss:$0 sm:$0xff]  ;;  %s1130_s17 = smov 104  }
   0x4   :  { %s1131_s0 = smov 120   ;;  %s1132_s18 = smov 112   ;;  %vm122_vm1 = vcmask 64512   ;;  %vm267_vm2 = vcmask 1043456   ;;  %vm360_vm3 = vcmask 130048   ;;  %vm362_vm4 = vcmask 195584  }
   0x5   :  { %s1133_s2 = smov 96   ;;  %s1134_s19 = smov 64  }
   0x6   :  { %80 = vmatpush.bf16.msra.mxu0 %v1014_v1  ;;  %s1135_s20 = smov 8   ;;  %s1136_s21 = smov 24  }
   0x7   :  { %s1137_s22 = smov 16  }
   0x9   :  { %947 = vmatmul.msk.bf16.vlgmr.msra.gmra.mxu0 %vm69_vm0, %v48_v4 }
  0x86   :  { %v82_v6 = vpop.f32.mrf.mxu0 }
  0x87   :  { %v83_v7 = vadd.f32 %v1233_v5, %v82_v6 }
  0x89   :  { %110 = vrot.lane.b32.xlu1 %v83_v7, %s1130_s17  ;;  %104 = vrot.lane.b32.xlu0 %v83_v7, %s1131_s0  ;;  %v87_v8 = vmul.f32 0.35355338, %v83_v7  ;;  %v113_v9 = vpack.c.bf16 %v83_v7, %v83_v7 }
  0x8b   :  { %v118_v10 = vunpack.c.l.b16 %v113_v9  ;;  %v99_v27 = vpack.c.bf16 %v87_v8, %v87_v8 }
  0x8d   :  { %v1240_v11 = vpack.c.b16 %v118_v10, %v118_v10 }
  0x8e   :  { %v84_v44 = vpop.f32.mrf.mxu0 }
  0x8f   :  { %v85_v49 = vadd.f32 %v1233_v5, %v84_v44 }
  0x91   :  { %107 = vrot.lane.b32.xlu0 %v83_v7, %s1132_s18 }
  0x99   :  { %93 = vrot.lane.b32.xlu0 %v87_v8, %s1132_s18 }
  0xa1   :  { %120 = vrot.lane.b32.xlu0 %v1240_v11, %s1133_s2 }
  0xfb   :  { %v105_v12 = vpop.permute.xlu0 %104  ;;  %v111_v14 = vpop.permute.xlu1 %110 }
  0xfc   :  { %v114_v13 = vpack.c.bf16 %v105_v12, %v105_v12  ;;  %v116_v16 = vpack.c.bf16 %v111_v14, %v111_v14 }
  0xfe   :  { %v143_v15 = vunpack.c.l.b16 %v114_v13  ;;  %v191_v19 = vunpack.c.l.b16 %v116_v16 }
 0x100   :  { %v144_v17 = vpack.c.b16 %v143_v15, %v143_v15  ;;  %v192_v22 = vpack.c.b16 %v191_v19, %v191_v19 }
 0x102   :  { %145 = vrot.lane.b32.xlu1 %v144_v17, %s1133_s2 }
 0x103   :  { %v108_v18 = vpop.permute.xlu0 %107 }
 0x104   :  { %v115_v20 = vpack.c.bf16 %v108_v18, %v108_v18  ;;  %v1283_v18 = vmul.f32 0.35355338, %v85_v49 }
 0x106   :  { %v167_v21 = vunpack.c.l.b16 %v115_v20 }
 0x108   :  { %v168_v23 = vpack.c.b16 %v167_v21, %v167_v21 }
 0x10a   :  { %193 = vrot.lane.b32.xlu1 %v192_v22, %s1133_s2  ;;  %169 = vrot.lane.b32.xlu2 %v168_v23, %s1133_s2 }
 0x10b   :  { %v94_v24 = vpop.permute.xlu0 %93 }
 0x10c   :  { %v101_v30 = vpack.c.bf16 %v94_v24, %v94_v24 }
 0x112   :  { %90 = vrot.lane.b32.xlu2 %v87_v8, %s1131_s0 }
 0x113   :  { %v121_v25 = vpop.permute.xlu0 %120 }
 0x114   :  { %v127_v26 = vsel %vm122_vm1, %v121_v25, 0 }
 0x115   :  { %136 = vmatpush.bf16.xpose.msra.mxu1 %v127_v26 }
 0x11a   :  { %96 = vrot.lane.b32.xlu2 %v87_v8, %s1130_s17 }
 0x11c   :  { %948 = vmatmul.msk.bf16.vlgmr.msra.gmra.mxu1 %vm122_vm1, %v99_v27 }
 0x164   :  { %v170_v28 = vpop.permute.xlu2 %169 }
 0x165   :  { %v175_v29 = vsel %vm122_vm1, %v170_v28, 0 }
 0x166   :  { %184 = vmatpush.bf16.xpose.msra.mxu3 %v175_v29 }
 0x16c   :  { %v91_v33 = vpop.permute.xlu2 %90 }
 0x16d   :  { %950 = vmatmul.msk.bf16.vlgmr.msra.gmra.mxu3 %vm122_vm1, %v101_v30  ;;  %v100_v34 = vpack.c.bf16 %v91_v33, %v91_v33 }
 0x174   :  { %v146_v31 = vpop.permute.xlu1 %145  ;;  %v97_v37 = vpop.permute.xlu2 %96 }
 0x175   :  { %v151_v32 = vsel %vm122_vm1, %v146_v31, 0  ;;  %v102_v38 = vpack.c.bf16 %v97_v37, %v97_v37 }
 0x176   :  { %160 = vmatpush.bf16.xpose.msra.mxu2 %v151_v32 }
 0x17c   :  { %v194_v35 = vpop.permute.xlu1 %193 }
 0x17d   :  { %949 = vmatmul.msk.bf16.vlgmr.msra.gmra.mxu2 %vm122_vm1, %v100_v34  ;;  %v199_v36 = vsel %vm122_vm1, %v194_v35, 0 }
 0x17e   :  { %208 = vmatpush.bf16.xpose.msrb.mxu0 %v199_v36 }
 0x185   :  { %951 = vmatmul.msk.bf16.vlgmr.msrb.gmra.mxu0 %vm122_vm1, %v102_v38 }
 0x199   :  { %v1257_v39 = vpop.f32.mrf.mxu1 }
 0x19a   :  { %v214_v52 = vsel %vm122_vm1, %v1257_v39, -inf }
 0x1a1   :  { %v140_v40 = vpop.f32.mrf.mxu1 }
 0x1f0   :  { %v186_v41 = vpop.f32.mrf.mxu3 }
 0x1f1   :  { %v220_v42 = vsel %vm122_vm1, %v186_v41, -inf }
 0x1f2   :  { %221 = vmax.xlane.f32.xlu2 %v220_v42 }
 0x1f8   :  { %v188_v43 = vpop.f32.mrf.mxu3 }
 0x200   :  { %v162_v45 = vpop.f32.mrf.mxu2 }
 0x201   :  { %v217_v46 = vsel %vm122_vm1, %v162_v45, -inf }
 0x202   :  { %218 = vmax.xlane.f32.xlu1 %v217_v46  ;;  %v210_v47 = vpop.f32.mrf.mxu0 }
 0x203   :  { %v223_v48 = vsel %vm122_vm1, %v210_v47, -inf }
 0x204   :  { %224 = vmax.xlane.f32.xlu0 %v223_v48 }
 0x208   :  { %v164_v50 = vpop.f32.mrf.mxu2 }
 0x20a   :  { %379 = vrot.lane.b32.xlu2 %v85_v49, %s1131_s0  ;;  %v212_v51 = vpop.f32.mrf.mxu0 }
 0x218   :  { %385 = vrot.lane.b32.xlu0 %v85_v49, %s1130_s17 }
 0x21b   :  { %382 = vrot.lane.b32.xlu1 %v85_v49, %s1132_s18 }
 0x223   :  { %305 = vrot.lane.b32.xlu1 %v168_v23, %s1134_s19  ;;  %v388_v23 = vpack.c.bf16 %v85_v49, %v85_v49 }
 0x225   :  { %v393_v26 = vunpack.c.l.b16 %v388_v23 }
 0x227   :  { %v1296_v27 = vpack.c.b16 %v393_v26, %v393_v26 }
 0x22b   :  { %326 = vrot.lane.b32.xlu1 %v192_v22, %s1134_s19 }
 0x233   :  { %215 = vmax.xlane.f32.xlu2 %v214_v52 }
 0x24b   :  { %284 = vrot.lane.b32.xlu2 %v144_v17, %s1134_s19 }
 0x265   :  { %v222_v53 = vpop.xlane.xlu2 %221 }
 0x266   :  { %v228_v10 = vsub.f32 %v186_v41, %v222_v53 }
 0x268   :  { %v234_v15 = vmul.f32 1.442695, %v228_v10 }
 0x26d   :  { %v380_v54 = vpop.permute.xlu2 %379 }
 0x26e   :  { %v389_v55 = vpack.c.bf16 %v380_v54, %v380_v54 }
 0x270   :  { %v417_v56 = vunpack.c.l.b16 %v389_v55 }
 0x272   :  { %v1271_v57 = vpack.c.b16 %v417_v56, %v417_v56 }
 0x274   :  { %419 = vrot.lane.b32.xlu0 %v1271_v57, %s1133_s2 }
 0x275   :  { %v219_v58 = vpop.xlane.xlu1 %218 }
 0x276   :  { %v227_v59 = vsub.f32 %v162_v45, %v219_v58 }
 0x277   :  { %v225_v63 = vpop.xlane.xlu0 %224 }
 0x278   :  { %v232_v60 = vmul.f32 1.442695, %v227_v59  ;;  %v229_v0 = vsub.f32 %v210_v47, %v225_v63 }
 0x27a   :  { %1062 = vpow2.f32 %v232_v60  ;;  %v236_v6 = vmul.f32 1.442695, %v229_v0 }
 0x27c   :  { %1064 = vpow2.f32 %v236_v6 }
 0x27d   :  { %1066 = vpow2.f32 %v234_v15 }
 0x280   :  { %v1063_v61 = vpop.eup %1062 }
 0x281   :  { %v241_v62 = vsel %vm122_vm1, %v1063_v61, 0.0 }
 0x282   :  { %242 = vadd.xlane.f32.xlu1 %v241_v62  ;;  %v1065_v17 = vpop.eup %1064 }
 0x283   :  { %v247_v20 = vsel %vm122_vm1, %v1065_v17, 0.0  ;;  %v1067_v22 = vpop.eup %1066 }
 0x284   :  { %v244_v24 = vsel %vm122_vm1, %v1067_v22, 0.0 }
 0x28a   :  { %v386_v4 = vpop.permute.xlu0 %385 }
 0x28b   :  { %v391_v8 = vpack.c.bf16 %v386_v4, %v386_v4  ;;  %v374_v4 = vpack.c.bf16 %v1283_v18, %v1283_v18 }
 0x28d   :  { %v383_v1 = vpop.permute.xlu1 %382  ;;  %v465_v12 = vunpack.c.l.b16 %v391_v8 }
 0x28e   :  { %v390_v5 = vpack.c.bf16 %v383_v1, %v383_v1 }
 0x28f   :  { %v1281_v16 = vpack.c.b16 %v465_v12, %v465_v12 }
 0x290   :  { %v441_v7 = vunpack.c.l.b16 %v390_v5 }
 0x292   :  { %v1276_v9 = vpack.c.b16 %v441_v7, %v441_v7 }
 0x294   :  { %443 = vrot.lane.b32.xlu2 %v1276_v9, %s1133_s2 }
 0x295   :  { %v306_v13 = vpop.permute.xlu1 %305 }
 0x296   :  { %v311_v14 = vsel %vm267_vm2, %v306_v13, 0 }
 0x297   :  { %320 = vmatpush.bf16.msrb.mxu3 %v311_v14 }
 0x29b   :  { %467 = vrot.lane.b32.xlu1 %v1281_v16, %s1133_s2 }
 0x29c   :  { %365 = vrot.lane.b32.xlu2 %v1283_v18, %s1131_s0 }
 0x29d   :  { %v327_v19 = vpop.permute.xlu1 %326 }
 0x29e   :  { %v332_v21 = vsel %vm267_vm2, %v327_v19, 0  ;;  %248 = vadd.xlane.f32.xlu0 %v247_v20 }
 0x29f   :  { %341 = vmatpush.bf16.msra.mxu0 %v332_v21 }
 0x2a3   :  { %262 = vrot.lane.b32.xlu1 %v1240_v11, %s1134_s19 }
 0x2a4   :  { %371 = vrot.lane.b32.xlu2 %v1283_v18, %s1130_s17 }
 0x2a6   :  { %245 = vadd.xlane.f32.xlu0 %v244_v24  ;;  %v216_v25 = vpop.xlane.xlu2 %215 }
 0x2a7   :  { %v226_v11 = vsub.f32 %v1257_v39, %v216_v25 }
 0x2a9   :  { %v230_v30 = vmul.f32 1.442695, %v226_v11 }
 0x2ab   :  { %1068 = vpow2.f32 %v230_v30 }
 0x2ac   :  { %395 = vrot.lane.b32.xlu2 %v1296_v27, %s1133_s2 }
 0x2ae   :  { %v285_v28 = vpop.permute.xlu2 %284 }
 0x2af   :  { %v290_v29 = vsel %vm267_vm2, %v285_v28, 0 }
 0x2b0   :  { %299 = vmatpush.bf16.msrb.mxu2 %v290_v29 }
 0x2b1   :  { %v1069_v31 = vpop.eup %1068 }
 0x2b2   :  { %v238_v32 = vsel %vm122_vm1, %v1069_v31, 0.0 }
 0x2ba   :  { %368 = vrot.lane.b32.xlu0 %v1283_v18, %s1132_s18 }
 0x2e4   :  { %239 = vadd.xlane.f32.xlu0 %v238_v32 }
 0x2e6   :  { %v420_v33 = vpop.permute.xlu0 %419 }
 0x2e7   :  { %v425_v34 = vsel %vm122_vm1, %v420_v33, 0 }
 0x2e8   :  { %434 = vmatpush.bf16.xpose.msra.mxu2 %v425_v34 }
 0x2ee   :  { %v444_v35 = vpop.permute.xlu2 %443 }
 0x2ef   :  { %v449_v36 = vsel %vm122_vm1, %v444_v35, 0 }
 0x2f0   :  { %458 = vmatpush.bf16.xpose.msra.mxu3 %v449_v36 }
 0x2f5   :  { %v243_v37 = vpop.xlane.xlu1 %242 }
 0x2f6   :  { %1070 = vrcp.f32 %v243_v37  ;;  %v366_v39 = vpop.permute.xlu2 %365 }
 0x2f7   :  { %v375_v45 = vpack.c.bf16 %v366_v39, %v366_v39 }
 0x2fc   :  { %v1071_v38 = vpop.eup %1070 }
 0x2fd   :  { %v255_v40 = vmul.f32 %v1071_v38, %v1063_v61 }
 0x2fe   :  { %v372_v42 = vpop.permute.xlu2 %371 }
 0x2ff   :  { %v259_v41 = vpack.c.bf16 %v255_v40, %v255_v40  ;;  %v377_v59 = vpack.c.bf16 %v372_v42, %v372_v42 }
 0x301   :  { %953 = vmatmul.msk.bf16.vlgmr.msrb.gmra.mxu2 %vm122_vm1, %v259_v41 }
 0x306   :  { %v396_v47 = vpop.permute.xlu2 %395 }
 0x307   :  { %v401_v50 = vsel %vm122_vm1, %v396_v47, 0 }
 0x30d   :  { %v468_v43 = vpop.permute.xlu1 %467 }
 0x30e   :  { %v473_v44 = vsel %vm122_vm1, %v468_v43, 0 }
 0x30f   :  { %482 = vmatpush.bf16.xpose.msrb.mxu0 %v473_v44 }
 0x311   :  { %v249_v46 = vpop.xlane.xlu0 %248  ;;  %957 = vmatmul.msk.bf16.vlgmr.msra.gmra.mxu2 %vm122_vm1, %v375_v45 }
 0x312   :  { %1072 = vrcp.f32 %v249_v46 }
 0x315   :  { %v263_v48 = vpop.permute.xlu1 %262 }
 0x316   :  { %v269_v49 = vsel %vm267_vm2, %v263_v48, 0 }
 0x317   :  { %278 = vmatpush.bf16.msrb.mxu1 %v269_v49 }
 0x318   :  { %v1073_v51 = vpop.eup %1072 }
 0x319   :  { %v257_v52 = vmul.f32 %v1073_v51, %v1065_v17  ;;  %v246_v53 = vpop.xlane.xlu0 %245 }
 0x31a   :  { %1074 = vrcp.f32 %v246_v53 }
 0x31b   :  { %410 = vmatpush.bf16.xpose.msra.mxu1 %v401_v50  ;;  %v261_v54 = vpack.c.bf16 %v257_v52, %v257_v52 }
 0x31d   :  { %955 = vmatmul.msk.bf16.vlgmr.msra.gmra.mxu0 %vm122_vm1, %v261_v54 }
 0x320   :  { %v1075_v55 = vpop.eup %1074 }
 0x321   :  { %v256_v56 = vmul.f32 %v1075_v55, %v1067_v22 }
 0x323   :  { %v260_v58 = vpack.c.bf16 %v256_v56, %v256_v56 }
 0x325   :  { %954 = vmatmul.msk.bf16.vlgmr.msrb.gmra.mxu3 %vm122_vm1, %v260_v58 }
 0x32c   :  { %v369_v60 = vpop.permute.xlu0 %368 }
 0x32d   :  { %959 = vmatmul.msk.bf16.vlgmr.msrb.gmra.mxu0 %vm122_vm1, %v377_v59  ;;  %v376_v61 = vpack.c.bf16 %v369_v60, %v369_v60 }
 0x335   :  { %958 = vmatmul.msk.bf16.vlgmr.msra.gmra.mxu3 %vm122_vm1, %v376_v61 }
 0x357   :  { %v240_v62 = vpop.xlane.xlu0 %239 }
 0x358   :  { %1076 = vrcp.f32 %v240_v62 }
 0x35e   :  { %v1077_v63 = vpop.eup %1076 }
 0x35f   :  { %v254_v0 = vmul.f32 %v1077_v63, %v1069_v31 }
 0x361   :  { %v258_v1 = vpack.c.bf16 %v254_v0, %v254_v0 }
 0x363   :  { %952 = vmatmul.msk.bf16.vlgmr.msrb.gmra.mxu1 %vm122_vm1, %v258_v1 }
 0x373   :  { %956 = vmatmul.msk.bf16.vlgmr.msra.gmra.mxu1 %vm122_vm1, %v374_v4 }
 0x384   :  { %v1320_v5 = vpop.f32.mrf.mxu2 }
 0x38c   :  { %v303_v6 = vpop.f32.mrf.mxu2 }
 0x394   :  { %v436_v7 = vpop.f32.mrf.mxu2 }
 0x395   :  { %v491_v8 = vsel %vm122_vm1, %v436_v7, -inf }
 0x396   :  { %492 = vmax.xlane.f32.xlu1 %v491_v8 }
 0x39a   :  { %v1323_v10 = vpop.f32.mrf.mxu0 }
 0x39c   :  { %v438_v12 = vpop.f32.mrf.mxu2 }
 0x3a2   :  { %v345_v13 = vpop.f32.mrf.mxu0 }
 0x3a8   :  { %v1325_v14 = vpop.f32.mrf.mxu3 }
 0x3aa   :  { %v484_v15 = vpop.f32.mrf.mxu0 }
 0x3ab   :  { %v497_v17 = vsel %vm122_vm1, %v484_v15, -inf }
 0x3ac   :  { %498 = vmax.xlane.f32.xlu0 %v497_v17 }
 0x3b0   :  { %v324_v18 = vpop.f32.mrf.mxu3 }
 0x3b2   :  { %v486_v19 = vpop.f32.mrf.mxu0 }
 0x3b8   :  { %v460_v20 = vpop.f32.mrf.mxu3 }
 0x3b9   :  { %v494_v21 = vsel %vm122_vm1, %v460_v20, -inf }
 0x3ba   :  { %495 = vmax.xlane.f32.xlu2 %v494_v21 }
 0x3c0   :  { %v462_v22 = vpop.f32.mrf.mxu3 }
 0x3e0   :  { %v1329_v23 = vpop.f32.mrf.mxu1 }
 0x3e8   :  { %v282_v24 = vpop.f32.mrf.mxu1 }
 0x3f0   :  { %v412_v25 = vpop.f32.mrf.mxu1 }
 0x3f1   :  { %v488_v26 = vsel %vm122_vm1, %v412_v25, -inf }
 0x3f2   :  { %489 = vmax.xlane.f32.xlu0 %v488_v26 }
 0x3f8   :  { %v414_v28 = vpop.f32.mrf.mxu1 }
 0x409   :  { %v493_v29 = vpop.xlane.xlu1 %492 }
 0x40a   :  { %v501_v11 = vsub.f32 %v436_v7, %v493_v29 }
 0x40c   :  { %v506_v30 = vmul.f32 1.442695, %v501_v11 }
 0x40e   :  { %1078 = vpow2.f32 %v506_v30 }
 0x414   :  { %v1079_v31 = vpop.eup %1078 }
 0x415   :  { %v515_v32 = vsel %vm122_vm1, %v1079_v31, 0.0 }
 0x416   :  { %516 = vadd.xlane.f32.xlu1 %v515_v32 }
 0x41f   :  { %v499_v33 = vpop.xlane.xlu0 %498 }
 0x420   :  { %v503_v34 = vsub.f32 %v484_v15, %v499_v33 }
 0x422   :  { %v510_v35 = vmul.f32 1.442695, %v503_v34 }
 0x424   :  { %1080 = vpow2.f32 %v510_v35 }
 0x42a   :  { %v1081_v36 = vpop.eup %1080 }
 0x42b   :  { %v521_v37 = vsel %vm122_vm1, %v1081_v36, 0.0 }
 0x42c   :  { %522 = vadd.xlane.f32.xlu0 %v521_v37 }
 0x42d   :  { %v496_v38 = vpop.xlane.xlu2 %495 }
 0x42e   :  { %v502_v40 = vsub.f32 %v460_v20, %v496_v38 }
 0x42f   :  { %557 = vrot.lane.b32.xlu1 %v1271_v57, %s1134_s19 }
 0x430   :  { %v508_v41 = vmul.f32 1.442695, %v502_v40 }
 0x432   :  { %1082 = vpow2.f32 %v508_v41  ;;  %v1055_v41 = vld [vmem:[%s1448_s4] ss:$0 sm:$0xff] }
 0x438   :  { %v1083_v39 = vpop.eup %1082 }
 0x439   :  { %v518_v42 = vsel %vm122_vm1, %v1083_v39, 0.0 }
 0x43a   :  { %519 = vadd.xlane.f32.xlu2 %v518_v42 }
 0x440   :  { %599 = vrot.lane.b32.xlu0 %v1281_v16, %s1134_s19 }
 0x448   :  { %536 = vrot.lane.b32.xlu0 %v1296_v27, %s1134_s19 }
 0x452   :  { %578 = vrot.lane.b32.xlu2 %v1276_v9, %s1134_s19 }
 0x465   :  { %v490_v43 = vpop.xlane.xlu0 %489 }
 0x466   :  { %v500_v44 = vsub.f32 %v412_v25, %v490_v43 }
 0x468   :  { %v504_v45 = vmul.f32 1.442695, %v500_v44 }
 0x46a   :  { %1084 = vpow2.f32 %v504_v45 }
 0x470   :  { %v1085_v57 = vpop.eup %1084 }
 0x471   :  { %v512_v46 = vsel %vm122_vm1, %v1085_v57, 0.0 }
 0x472   :  { %513 = vadd.xlane.f32.xlu1 %v512_v46 }
 0x489   :  { %v517_v47 = vpop.xlane.xlu1 %516 }
 0x48a   :  { %1086 = vrcp.f32 %v517_v47  ;;  %v1138_v47 = vmov 32.0  }
 0x490   :  { %v1087_v48 = vpop.eup %1086 }
 0x491   :  { %v529_v49 = vmul.f32 %v1087_v48, %v1079_v31 }
 0x493   :  { %v533_v27 = vpack.c.bf16 %v529_v49, %v529_v49 }
 0x49f   :  { %v523_v51 = vpop.xlane.xlu0 %522 }
 0x4a0   :  { %1088 = vrcp.f32 %v523_v51 }
 0x4a1   :  { %v558_v50 = vpop.permute.xlu1 %557 }
 0x4a2   :  { %v563_v16 = vsel %vm267_vm2, %v558_v50, 0 }
 0x4a3   :  { %572 = vmatpush.bf16.msrb.mxu2 %v563_v16 }
 0x4a6   :  { %961 = vmatmul.msk.bf16.vlgmr.msrb.gmra.mxu2 %vm122_vm1, %v533_v27  ;;  %v1089_v52 = vpop.eup %1088 }
 0x4a7   :  { %v531_v53 = vmul.f32 %v1089_v52, %v1081_v36 }
 0x4a9   :  { %v535_v58 = vpack.c.bf16 %v531_v53, %v531_v53 }
 0x4ad   :  { %v520_v9 = vpop.xlane.xlu2 %519 }
 0x4ae   :  { %1090 = vrcp.f32 %v520_v9 }
 0x4b2   :  { %v600_v54 = vpop.permute.xlu0 %599 }
 0x4b3   :  { %v605_v55 = vsel %vm267_vm2, %v600_v54, 0 }
 0x4b4   :  { %v1091_v56 = vpop.eup %1090  ;;  %614 = vmatpush.bf16.msra.mxu0 %v605_v55 }
 0x4b5   :  { %v530_v59 = vmul.f32 %v1091_v56, %v1083_v39  ;;  %v579_v60 = vpop.permute.xlu2 %578 }
 0x4b6   :  { %v584_v61 = vsel %vm267_vm2, %v579_v60, 0  ;;  %v1019_v60 = vld [vmem:[%s1451_s7 + $0x8] sm:$0xff] }
 0x4b7   :  { %v534_v62 = vpack.c.bf16 %v530_v59, %v530_v59  ;;  %593 = vmatpush.bf16.msrb.mxu3 %v584_v61  ;;  %963 = vmatmul.msk.bf16.vlgmr.msra.gmra.mxu0 %vm122_vm1, %v535_v58 }
 0x4b8   :  { %768 = vmatpush.bf16.msra.mxu2 %v1019_v60 }
 0x4ba   :  { %962 = vmatmul.msk.bf16.vlgmr.msrb.gmra.mxu3 %vm122_vm1, %v534_v62  ;;  %v537_v63 = vpop.permute.xlu0 %536 }
 0x4bb   :  { %v542_v0 = vsel %vm267_vm2, %v537_v63, 0  ;;  %v1018_v63 = vld [vmem:[%s1451_s7] sm:$0xff]  ;;  %s927_s7 = sshll.u32 %s1457_s13, 4  ;;  %s928_s7 = int_to_ptr.hbm [resolvable:$true] %s927_s7 }
 0x4bc   :  { %551 = vmatpush.bf16.msrb.mxu1 %v542_v0  ;;  %769 = vmatpush.bf16.msra.mxu2 %v1018_v63 }
 0x4e5   :  { %v514_v1 = vpop.xlane.xlu1 %513 }
 0x4e6   :  { %1092 = vrcp.f32 %v514_v1  ;;  %v1027_v1 = vld [vmem:[%s1453_s9 + $0x38] sm:$0xff] }
 0x4e7   :  { %1094 = vrcp.f32 %v1138_v47  ;;  %847 = vmatpush.bf16.msra.mxu3 %v1027_v1  ;;  %v1059_v47 = vld [vmem:[%s1454_s10] ss:$0 sm:$0xff] }
 0x4ec   :  { %v1093_v4 = vpop.eup %1092 }
 0x4ed   :  { %v528_v6 = vmul.f32 %v1093_v4, %v1085_v57  ;;  %v1095_v48 = vpop.eup %1094 }
 0x4ee   :  { %v682_v49 = vmul.f32 32.0, %v1095_v48  ;;  %vm686_vm5 = vweird.f32 %v1095_v48 }
 0x4ef   :  { %v532_v7 = vpack.c.bf16 %v528_v6, %v528_v6 }
 0x4f0   :  { %v683_v50 = vsub.f32 1.0, %v682_v49 }
 0x4f1   :  { %960 = vmatmul.msk.bf16.vlgmr.msrb.gmra.mxu1 %vm122_vm1, %v532_v7  ;;  %v1026_v7 = vld [vmem:[%s1453_s9 + $0x30] sm:$0xff] }
 0x4f2   :  { %v684_v16 = vmul.f32 %v1095_v48, %v683_v50  ;;  %848 = vmatpush.bf16.msra.mxu3 %v1026_v7 }
 0x4f4   :  { %v685_v27 = vadd.f32 %v1095_v48, %v684_v16 }
 0x4f6   :  { %v1373_v51 = vsel %vm686_vm5, %v1095_v48, %v685_v27 }
 0x529   :  { %v574_v8 = vpop.f32.mrf.mxu2 }
 0x52a   :  { %v1039_v12 = vpack.i.bf16 %v574_v8, %v1320_v5  ;;  %v1017_v5 = vld [vmem:[%s1447_s3 + $0x8] sm:$0xff] }
 0x52b   :  { %665 = vmatpush.bf16.msra.mxu1 %v1017_v5 }
 0x52c   :  { %1040 = vrot.lane.b32.xlu2 %v1039_v12, %s1135_s20 }
 0x531   :  { %v576_v13 = vpop.f32.mrf.mxu2 }
 0x534   :  { %v616_v15 = vpop.f32.mrf.mxu0 }
 0x535   :  { %v1049_v17 = vpack.i.bf16 %v616_v15, %v1323_v10  ;;  %v1016_v10 = vld [vmem:[%s1447_s3] sm:$0xff]  ;;  %v1025_v15 = vld [vmem:[%s1453_s9 + $0x28] sm:$0xff] }
 0x536   :  { %666 = vmatpush.bf16.msra.mxu1 %v1016_v10  ;;  %849 = vmatpush.bf16.msra.mxu3 %v1025_v15 }
 0x537   :  { %1050 = vrot.lane.b32.xlu2 %v1049_v17, %s1136_s21 }
 0x53c   :  { %v618_v18 = vpop.f32.mrf.mxu0 }
 0x53d   :  { %v595_v19 = vpop.f32.mrf.mxu3 }
 0x53e   :  { %v1044_v20 = vpack.i.bf16 %v595_v19, %v1325_v14  ;;  %v1024_v19 = vld [vmem:[%s1453_s9 + $0x20] sm:$0xff] }
 0x53f   :  { %850 = vmatpush.bf16.msra.mxu3 %v1024_v19 }
 0x540   :  { %1045 = vrot.lane.b32.xlu0 %v1044_v20, %s1137_s22 }
 0x545   :  { %v597_v21 = vpop.f32.mrf.mxu3 }
 0x56e   :  { %v553_v22 = vpop.f32.mrf.mxu1 }
 0x576   :  { %v555_v24 = vpop.f32.mrf.mxu1 }
 0x586   :  { %v1041_v25 = vpop.permute.xlu2 %1040 }
 0x587   :  { %v1043_v26 = vunpack.i.h.bf16 %v1041_v25  ;;  %v1042_v28 = vunpack.i.l.bf16 %v1041_v25 }
 0x589   :  { %v359_v31 = vsel %vm122_vm1, %v1329_v23, %v1042_v28  ;;  %v632_v32 = vsel %vm122_vm1, %v553_v22, %v1043_v26  ;;  %v1056_v28 = vld [vmem:[%s1449_s5] ss:$0 sm:$0xff] }
 0x591   :  { %v1051_v29 = vpop.permute.xlu2 %1050 }
 0x592   :  { %v1053_v33 = vunpack.i.h.bf16 %v1051_v29  ;;  %v1052_v34 = vunpack.i.l.bf16 %v1051_v29 }
 0x5b2   :  { %v1046_v14 = vpop.permute.xlu0 %1045 }
 0x5b3   :  { %v1048_v11 = vunpack.i.h.bf16 %v1046_v14  ;;  %v1047_v30 = vunpack.i.l.bf16 %v1046_v14 }
 0x5b5   :  { %v361_v35 = vsel %vm360_vm3, %v359_v31, %v1047_v30  ;;  %v633_v36 = vsel %vm360_vm3, %v632_v32, %v1048_v11  ;;  %v1057_v30 = vld [vmem:[%s1450_s6] ss:$0 sm:$0xff] }
 0x5b6   :  { %v363_v37 = vsel %vm362_vm4, %v361_v35, %v1052_v34  ;;  %v634_v38 = vsel %vm362_vm4, %v633_v36, %v1053_v33 }
 0x5b7   :  { %v635_v40 = vpack.c.bf16 %v634_v38, %v363_v37  ;;  %v1023_v37 = vld [vmem:[%s1453_s9 + $0x18] sm:$0xff]  ;;  %v1022_v38 = vld [vmem:[%s1453_s9 + $0x10] sm:$0xff] }
 0x5b8   :  { %851 = vmatpush.bf16.msra.mxu3 %v1023_v37 }
 0x5b9   :  { %972 = vmatmul.msk.bf16.vlgmr.msra.gmra.mxu1 %vm69_vm0, %v635_v40  ;;  %v1021_v40 = vld [vmem:[%s1453_s9 + $0x8] sm:$0xff] }
 0x5bc   :  { %852 = vmatpush.bf16.msra.mxu3 %v1022_v38 }
 0x5c0   :  { %853 = vmatpush.bf16.msra.mxu3 %v1021_v40 }
 0x636   :  { %v668_v39 = vpop.f32.mrf.mxu1 }
 0x637   :  { %v669_v42 = vadd.f32 %v1055_v41, %v668_v39 }
 0x639   :  { %v673_v43 = vadd.f32 %v669_v42, %v1220_v2  ;;  %v1058_v42 = vld [vmem:[%s1452_s8] ss:$0 sm:$0xff] }
 0x63b   :  { %v675_v23 = vsel %vm69_vm0, %v673_v43, 0.0 }
 0x63c   :  { %676 = vadd.xlane.f32.xlu0 %v675_v23 }
 0x63e   :  { %v670_v44 = vpop.f32.mrf.mxu1 }
 0x63f   :  { %v671_v45 = vadd.f32 %v1055_v41, %v670_v44  ;;  %v1020_v41 = vld [vmem:[%s1453_s9] sm:$0xff] }
 0x640   :  { %854 = vmatpush.bf16.msra.mxu3 %v1020_v41 }
 0x641   :  { %v674_v57 = vadd.f32 %v671_v45, %v1225_v3 }
 0x643   :  { %v678_v46 = vsel %vm69_vm0, %v674_v57, 0.0 }
 0x644   :  { %679 = vadd.xlane.f32.xlu2 %v678_v46 }
 0x6af   :  { %v677_v2 = vpop.xlane.xlu0 %676 }
 0x6b0   :  { %v688_v9 = vmul.f32 %v1373_v51, %v677_v2 }
 0x6b2   :  { %v690_v52 = vsub.f32 %v673_v43, %v688_v9 }
 0x6b4   :  { %v692_v53 = vmul.f32 %v690_v52, %v690_v52 }
 0x6b6   :  { %v694_v3 = vsel %vm69_vm0, %v692_v53, 0.0 }
 0x6b7   :  { %v680_v54 = vpop.xlane.xlu2 %679  ;;  %695 = vadd.xlane.f32.xlu1 %v694_v3 }
 0x6b8   :  { %v689_v55 = vmul.f32 %v1373_v51, %v680_v54 }
 0x6ba   :  { %v691_v56 = vsub.f32 %v674_v57, %v689_v55 }
 0x6bc   :  { %v693_v58 = vmul.f32 %v691_v56, %v691_v56 }
 0x6be   :  { %v697_v59 = vsel %vm69_vm0, %v693_v58, 0.0 }
 0x6bf   :  { %698 = vadd.xlane.f32.xlu1 %v697_v59 }
 0x72a   :  { %v696_v61 = vpop.xlane.xlu1 %695 }
 0x72b   :  { %v700_v62 = vmul.f32 %v696_v61, %v1373_v51 }
 0x72d   :  { %v702_v0 = vadd.f32 1e-05, %v700_v62 }
 0x72f   :  { %1096 = vrsqrt.f32 %v702_v0  ;;  %vm710_vm7 = vweird.f32 %v702_v0 }
 0x732   :  { %v699_v4 = vpop.xlane.xlu1 %698 }
 0x733   :  { %v701_v6 = vmul.f32 %v699_v4, %v1373_v51 }
 0x735   :  { %v1097_v8 = vpop.eup %1096  ;;  %v703_v12 = vadd.f32 1e-05, %v701_v6 }
 0x736   :  { %v705_v13 = vmul.f32 %v1097_v8, %v702_v0  ;;  %vm711_vm6 = vweird.f32 %v1097_v8 }
 0x737   :  { %1098 = vrsqrt.f32 %v703_v12  ;;  %vm712_vm8 = vmor %vm710_vm7, %vm711_vm6  ;;  %vm720_vm10 = vweird.f32 %v703_v12 }
 0x738   :  { %v706_v17 = vmul.f32 %v1097_v8, %v705_v13 }
 0x73a   :  { %v707_v18 = vmul.f32 0.5, %v706_v17 }
 0x73c   :  { %v708_v20 = vsub.f32 1.5, %v707_v18 }
 0x73d   :  { %v1099_v21 = vpop.eup %1098 }
 0x73e   :  { %v709_v22 = vmul.f32 %v1097_v8, %v708_v20  ;;  %v715_v5 = vmul.f32 %v1099_v21, %v703_v12  ;;  %vm721_vm9 = vweird.f32 %v1099_v21 }
 0x73f   :  { %vm722_vm11 = vmor %vm720_vm10, %vm721_vm9 }
 0x740   :  { %v716_v24 = vmul.f32 %v1099_v21, %v715_v5  ;;  %v713_v10 = vsel %vm712_vm8, %v1097_v8, %v709_v22 }
 0x741   :  { %v724_v29 = vmul.f32 %v713_v10, %v690_v52 }
 0x742   :  { %v717_v25 = vmul.f32 0.5, %v716_v24  ;;  %v1061_v24 = vld [vmem:[%s1456_s12] ss:$0 sm:$0xff]  ;;  %s1140_s12 = smov 128  }
 0x743   :  { %v730_v31 = vmul.f32 %v1056_v28, %v724_v29 }
 0x744   :  { %v718_v26 = vsub.f32 1.5, %v717_v25 }
 0x745   :  { %v736_v34 = vadd.f32 %v1057_v30, %v730_v31 }
 0x746   :  { %v719_v14 = vmul.f32 %v1099_v21, %v718_v26 }
 0x748   :  { %v723_v11 = vsel %vm722_vm11, %v1099_v21, %v719_v14  ;;  %v1060_v21 = vld [vmem:[%s1455_s11] ss:$0 sm:$0xff]  ;;  %s1139_s11 = smov [#allocation2]  }
 0x749   :  { %v725_v32 = vmul.f32 %v723_v11, %v691_v56  ;;  %s925_s15 = sshll.u32 %s1139_s11, 4  ;;  %s926_s15 = int_to_ptr.vmem [resolvable:$true] %s925_s15 }
 0x74b   :  { %v731_v33 = vmul.f32 %v1056_v28, %v725_v32 }
 0x74d   :  { %v737_v35 = vadd.f32 %v1057_v30, %v731_v33 }
 0x74f   :  { %v738_v36 = vpack.c.bf16 %v737_v35, %v736_v34 }
 0x751   :  { %981 = vmatmul.msk.bf16.vlgmr.msra.gmra.mxu2 %vm69_vm0, %v738_v36 }
 0x7d4   :  { %v771_v39 = vpop.f32.mrf.mxu2 }
 0x7d5   :  { %v772_v43 = vadd.f32 %v1058_v42, %v771_v39 }
 0x7d7   :  { %v776_v45 = vmax.f32 %v772_v43, 0.0 }
 0x7dc   :  { %v773_v23 = vpop.f32.mrf.mxu2 }
 0x7dd   :  { %v774_v44 = vadd.f32 %v1058_v42, %v773_v23 }
 0x7df   :  { %v777_v57 = vmax.f32 %v774_v44, 0.0 }
 0x7e1   :  { %v778_v46 = vpack.c.bf16 %v777_v57, %v776_v45 }
 0x7e3   :  { %855 = vmatmul.bf16.vlgmr.msra.gmra.mxu3 %v778_v46 }
 0x866   :  { %v856_v48 = vpop.f32.mrf.mxu3 }
 0x867   :  { %v857_v49 = vadd.f32 %v1059_v47, %v856_v48 }
 0x869   :  { %v861_v50 = vadd.f32 %v857_v49, %v736_v34 }
 0x86b   :  { %v863_v16 = vsel %vm69_vm0, %v861_v50, 0.0 }
 0x86c   :  { %864 = vadd.xlane.f32.xlu1 %v863_v16 }
 0x86e   :  { %v858_v27 = vpop.f32.mrf.mxu3 }
 0x86f   :  { %v859_v2 = vadd.f32 %v1059_v47, %v858_v27 }
 0x871   :  { %v862_v9 = vadd.f32 %v859_v2, %v737_v35 }
 0x873   :  { %v866_v52 = vsel %vm69_vm0, %v862_v9, 0.0 }
 0x874   :  { %867 = vadd.xlane.f32.xlu0 %v866_v52 }
 0x8df   :  { %v865_v53 = vpop.xlane.xlu1 %864 }
 0x8e0   :  { %v869_v3 = vmul.f32 %v865_v53, %v1373_v51 }
 0x8e2   :  { %v871_v54 = vsub.f32 %v861_v50, %v869_v3 }
 0x8e4   :  { %v873_v55 = vmul.f32 %v871_v54, %v871_v54 }
 0x8e6   :  { %v875_v56 = vsel %vm69_vm0, %v873_v55, 0.0 }
 0x8e7   :  { %v868_v58 = vpop.xlane.xlu0 %867  ;;  %876 = vadd.xlane.f32.xlu2 %v875_v56 }
 0x8e8   :  { %v870_v59 = vmul.f32 %v868_v58, %v1373_v51 }
 0x8ea   :  { %v872_v60 = vsub.f32 %v862_v9, %v870_v59 }
 0x8ec   :  { %v874_v61 = vmul.f32 %v872_v60, %v872_v60 }
 0x8ee   :  { %v878_v62 = vsel %vm69_vm0, %v874_v61, 0.0 }
 0x8ef   :  { %879 = vadd.xlane.f32.xlu1 %v878_v62 }
 0x95a   :  { %v877_v63 = vpop.xlane.xlu2 %876 }
 0x95b   :  { %v881_v0 = vmul.f32 %v877_v63, %v1373_v51 }
 0x95d   :  { %v883_v1 = vadd.f32 1e-05, %v881_v0 }
 0x95f   :  { %1100 = vrsqrt.f32 %v883_v1  ;;  %vm891_vm13 = vweird.f32 %v883_v1 }
 0x962   :  { %v880_v4 = vpop.xlane.xlu1 %879 }
 0x963   :  { %v882_v6 = vmul.f32 %v880_v4, %v1373_v51 }
 0x965   :  { %v1101_v7 = vpop.eup %1100  ;;  %v884_v8 = vadd.f32 1e-05, %v882_v6 }
 0x966   :  { %v886_v12 = vmul.f32 %v1101_v7, %v883_v1  ;;  %vm892_vm12 = vweird.f32 %v1101_v7 }
 0x967   :  { %1102 = vrsqrt.f32 %v884_v8  ;;  %vm893_vm14 = vmor %vm891_vm13, %vm892_vm12  ;;  %vm901_vm1 = vweird.f32 %v884_v8 }
 0x968   :  { %v887_v13 = vmul.f32 %v1101_v7, %v886_v12 }
 0x96a   :  { %v888_v15 = vmul.f32 0.5, %v887_v13 }
 0x96c   :  { %v889_v17 = vsub.f32 1.5, %v888_v15 }
 0x96d   :  { %v1103_v18 = vpop.eup %1102 }
 0x96e   :  { %v890_v19 = vmul.f32 %v1101_v7, %v889_v17  ;;  %v896_v20 = vmul.f32 %v1103_v18, %v884_v8  ;;  %vm902_vm15 = vweird.f32 %v1103_v18 }
 0x96f   :  { %vm903_vm2 = vmor %vm901_vm1, %vm902_vm15 }
 0x970   :  { %v894_v22 = vsel %vm893_vm14, %v1101_v7, %v890_v19  ;;  %v897_v5 = vmul.f32 %v1103_v18, %v896_v20 }
 0x971   :  { %v905_v51 = vmul.f32 %v894_v22, %v871_v54 }
 0x972   :  { %v898_v10 = vmul.f32 0.5, %v897_v5 }
 0x973   :  { %v911_v25 = vmul.f32 %v1060_v21, %v905_v51 }
 0x974   :  { %v899_v26 = vsub.f32 1.5, %v898_v10 }
 0x975   :  { %v917_v28 = vadd.f32 %v1061_v24, %v911_v25 }
 0x976   :  { %v900_v29 = vmul.f32 %v1103_v18, %v899_v26 }
 0x977   :  { %919 = vst.msk [vmem:[#allocation2] sm:$0xff] %vm69_vm0, %v917_v28 }
 0x978   :  { %v904_v14 = vsel %vm903_vm2, %v1103_v18, %v900_v29 }
 0x979   :  { %v906_v11 = vmul.f32 %v904_v14, %v872_v60 }
 0x97b   :  { %v912_v30 = vmul.f32 %v1060_v21, %v906_v11 }
 0x97d   :  { %v918_v31 = vadd.f32 %v1061_v24, %v912_v30 }
 0x97f   :  { %920 = vst.msk [vmem:[#allocation2 + $0x8] sm:$0xff] %vm69_vm0, %v918_v31 }
 0x980   :  { %933 = dma.vmem_to_hbm [thread:$0]  %s926_s15, 256, %s928_s7, [#allocation3], %s1140_s12, %s1140_s12, %s1135_s20  }
 0x981   :  { %1128 = dma.done.wait [#allocation3], 256  }
 0x982   :  { %1129 = vsyncadd [#allocation3], 4294967040 }
 0x983   :  { %938 = vsyncpa [#allocation3], 1 }

</bundles_post_ra>
